<compile_context>
chip_gen: v7x
topology: tpu7x:2x2x1
jax: 0.10.0
libtpu: 0.0.40
codegen_flags: <defaults>
</compile_context>

<pallas_src>
import functools

import jax
import jax.numpy as jnp
from jax.experimental import pallas as pl
from jax.experimental.pallas import tpu as pltpu


# ----------------------------------------------------------------------------- kernel


def _encoder_kernel(x_ref, wp_ref, o_ref, *, compute_dtype):
    """x_ref: (tm, size_pad) f32; wp_ref: (size_pad//32, tn) uint32 bit-packed
    +/-1 weights; o_ref: (tm, tn) int32."""
    packed = wp_ref[...]                                   # (kp, tn) uint32
    one = jnp.array(1.0, compute_dtype)
    neg = jnp.array(-1.0, compute_dtype)

    # Unpack 1 bit -> +/-1.  Host-side packing puts bit b of word row w at
    # original weight row (b * kp + w), so concatenating the 32 bit-planes
    # along the sublane axis restores the original (size_pad, tn) row order
    # with no reshuffle of x.  Pure VPU shift/compare/select work.
    pieces = []
    for b in range(32):
        bit = (packed >> jnp.uint32(b)) & jnp.uint32(1)
        pieces.append(jnp.where(bit != 0, one, neg))
    w = jnp.concatenate(pieces, axis=0)                    # (size_pad, tn)

    x = x_ref[...].astype(compute_dtype)
    y = jnp.dot(x, w, preferred_element_type=jnp.float32)  # MXU, f32 accumulation
    o_ref[...] = jnp.where(y > 0, jnp.int32(1), jnp.int32(-1))


# ----------------------------------------------------------------------------- tiling helpers


def _vmem_capacity_bytes():
    """Per-TensorCore VMEM capacity (128 MiB v5e/v6e, 64 MiB v7x)."""
    try:
        return int(pltpu.get_tpu_info().vmem_capacity_bytes)
    except Exception:
        return 64 * 1024 * 1024  # conservative fallback: v7x


def _pick_tm(batch):
    """MXU-aligned batch tile; full batch when small."""
    if batch <= 256:
        return batch
    for tm in (256, 128, 64, 32, 16, 8):
        if batch % tm == 0:
            return tm
    return batch  # odd large batch: single full-batch block


def _pick_tn(tm, size_pad, hd_dim, budget_bytes, compute_dtype):
    """Widest lane-dense output tile that fits the VMEM budget, keeping >= 2
    blocks along hd_dim (when possible) so v7x's two TensorCores both get
    work, and never over-padding hd_dim."""
    cbytes = jnp.dtype(compute_dtype).itemsize
    hd_ceil128 = pl.cdiv(hd_dim, 128) * 128

    def vmem_bytes(tn):
        x_blk = tm * size_pad * 4                 # f32 x block (constant across j -> single-buffered)
        w_blk = (size_pad // 32) * tn * 4         # bit-packed uint32 weight block
        o_blk = tm * tn * 4                       # int32 output block
        expand = size_pad * tn * cbytes           # in-kernel materialized +/-1 weight
        return x_blk + 2 * (w_blk + o_blk) + expand

    for tn in (2048, 1024, 512, 256, 128):
        if tn > hd_ceil128:
            continue                              # would over-pad hd_dim
        if hd_ceil128 >= 256 and hd_ceil128 // tn < 2:
            continue                              # keep >= 2 parallel output blocks (v7x megacore)
        if vmem_bytes(tn) <= budget_bytes:
            return tn
    return 128


def _pack_pm1_bits(w_t, kp):
    """Pack a (size_pad, hd_pad) +/-1 weight into (kp, hd_pad) uint32 words.

    Bit b of word row w on column n encodes sign(W_T[b*kp + w, n]) (1 -> +1,
    0 -> -1), matching the in-kernel bit-plane concatenation order."""
    size_pad, hd_pad = w_t.shape
    assert size_pad == 32 * kp
    bits = (w_t > 0).astype(jnp.uint32).reshape(32, kp, hd_pad)  # [b, w, n]
    packed = jnp.zeros((kp, hd_pad), dtype=jnp.uint32)
    for b in range(32):
        packed = packed | (bits[b] << jnp.uint32(b))
    return packed


# ----------------------------------------------------------------------------- wrapper


def encoder_forward(x, w, *, compute_dtype=jnp.float32, interpret=False):
    """HDC projection + hard_quantize.

    x: (B, size) float32 (already flattened).
    w: (hd_dim, size) frozen MAP-normalized projection weight, entries +/-1
       (nn.Linear layout, the PyTorch-equivalent parameter).
    Returns (B, hd_dim) int32 in {+1, -1}.

    compute_dtype: dtype the +/-1 weight (and x) are materialized in for the
    MXU. float32 (default) matches the f32 reference as closely as possible;
    bfloat16 halves the in-VMEM expansion footprint and takes the native bf16
    MXU path, at the cost of possible sign flips for dot products ~0.
    """
    B, size = x.shape
    hd_dim, size_w = w.shape
    assert size == size_w

    # Generation-dispatched VMEM budget (v5e/v6e: 128 MiB, v7x: 64 MiB).
    cap = _vmem_capacity_bytes()
    budget = int(cap * 0.60)
    vmem_limit = int(cap * 0.80)

    tm = _pick_tm(B)

    # Pad the k axis (size) to a multiple of 32 for bit-packing; x is padded
    # with zeros so the padded weight rows contribute nothing.
    size_pad = ((size + 31) // 32) * 32
    kp = size_pad // 32

    tn = _pick_tn(tm, size_pad, hd_dim, budget, compute_dtype)
    hd_pad = pl.cdiv(hd_dim, tn) * tn

    # One-time weight preprocessing (transpose, pad, bit-pack).
    w_t = jnp.zeros((size_pad, hd_pad), dtype=jnp.float32)
    w_t = w_t.at[:size, :hd_dim].set(w.T.astype(jnp.float32))
    packed = _pack_pm1_bits(w_t, kp)                       # (kp, hd_pad) uint32

    x_pad = x if size_pad == size else jnp.pad(x, ((0, 0), (0, size_pad - size)))

    grid = (B // tm, hd_pad // tn)  # no k axis: reduction is fully in-block

    kernel = functools.partial(_encoder_kernel, compute_dtype=compute_dtype)
    out = pl.pallas_call(
        kernel,
        out_shape=jax.ShapeDtypeStruct((B, hd_pad), jnp.int32),
        grid_spec=pltpu.PrefetchScalarGridSpec(
            num_scalar_prefetch=0,
            grid=grid,
            in_specs=[
                pl.BlockSpec((tm, size_pad), lambda i, j: (i, 0)),
                pl.BlockSpec((kp, tn), lambda i, j: (0, j)),
            ],
            out_specs=pl.BlockSpec((tm, tn), lambda i, j: (i, j)),
        ),
        compiler_params=pltpu.CompilerParams(
            dimension_semantics=("parallel", "parallel"),
            vmem_limit_bytes=vmem_limit,
        ),
        interpret=interpret,
    )(x_pad, packed)

    return out[:, :hd_dim] if hd_pad != hd_dim else out


def make_encoder_params(key, size, hd_dim):
    """Projection weight: normal init then MAP-normalized (sign -> {+1,-1}),
    frozen. Shape (hd_dim, size) like nn.Linear."""
    w = jax.random.normal(key, (hd_dim, size), dtype=jnp.float32)
    return jnp.where(w >= 0, 1.0, -1.0).astype(jnp.float32)


# ----------------------------------------------------------------------------- demo / check


if __name__ == "__main__":
    # Small shapes consistent with the module: batch=8, size=256, hd_dim=512.
    B, SIZE, HD_DIM = 8, 256, 512

    key = jax.random.PRNGKey(0)
    kx, kw = jax.random.split(key)

    x = jax.random.normal(kx, (B, SIZE), dtype=jnp.float32)
    W = make_encoder_params(kw, SIZE, HD_DIM)      # (hd_dim, size), entries +/-1

    out = encoder_forward(x, W)
    out = jax.block_until_ready(out)

    # Reference in plain JAX (x @ W.T in f32, hard quantize, int32).
    y_ref = x @ W.T
    ref = jnp.where(y_ref > 0, 1, -1).astype(jnp.int32)

    assert out.shape == (B, HD_DIM) and out.dtype == jnp.int32
    # Signs may only disagree where the dot product is numerically ~0 (MXU
    # tiled accumulation order vs the XLA reference matmul).
    ok = (out == ref) | (jnp.abs(y_ref) < 1e-3)
    assert bool(jnp.all(ok))

    print("KERNEL_OK")
</pallas_src>

<mosaic_0001>
module attributes {stable_mosaic.version = 11 : i64} {
  func.func @_encoder_kernel(%arg0: i32, %arg1: i32, %arg2: memref<8x256xf32, #tpu.memory_space<vmem>>, %arg3: memref<8x256xi32, #tpu.memory_space<vmem>>, %arg4: memref<8x256xi32, #tpu.memory_space<vmem>>) attributes {dimension_semantics = [#tpu.dimension_semantics<parallel>, #tpu.dimension_semantics<parallel>], iteration_bounds = array<i64: 1, 2>, scalar_prefetch = 0 : i64, scratch_operands = 0 : i64, tpu.core_type = #tpu.core_type<tc>, window_params = [{transform_indices = @transform_0, window_bounds = array<i64: 8, 256>}, {transform_indices = @transform_1, window_bounds = array<i64: 8, 256>}, {transform_indices = @transform_2, window_bounds = array<i64: 8, 256>}]} {
    %c0 = arith.constant 0 : index
    %c0_0 = arith.constant 0 : index
    %0 = vector.load %arg3[%c0, %c0_0] : memref<8x256xi32, #tpu.memory_space<vmem>>, vector<8x256xi32>
    %c0_i32 = arith.constant 0 : i32
    %1 = vector.broadcast %c0_i32 : i32 to vector<8x256xi32>
    %2 = arith.shrui %0, %1 : vector<8x256xi32>
    %c1_i32 = arith.constant 1 : i32
    %3 = vector.broadcast %c1_i32 : i32 to vector<8x256xi32>
    %4 = arith.andi %2, %3 : vector<8x256xi32>
    %c0_i32_1 = arith.constant 0 : i32
    %5 = vector.broadcast %c0_i32_1 : i32 to vector<8x256xi32>
    %6 = arith.cmpi ne, %4, %5 : vector<8x256xi32>
    %cst = arith.constant 1.000000e+00 : f32
    %cst_2 = arith.constant -1.000000e+00 : f32
    %7 = vector.broadcast %cst : f32 to vector<8x256xf32>
    %8 = vector.broadcast %cst_2 : f32 to vector<8x256xf32>
    %9 = arith.select %6, %7, %8 : vector<8x256xi1>, vector<8x256xf32>
    %c1_i32_3 = arith.constant 1 : i32
    %10 = vector.broadcast %c1_i32_3 : i32 to vector<8x256xi32>
    %11 = arith.shrui %0, %10 : vector<8x256xi32>
    %c1_i32_4 = arith.constant 1 : i32
    %12 = vector.broadcast %c1_i32_4 : i32 to vector<8x256xi32>
    %13 = arith.andi %11, %12 : vector<8x256xi32>
    %c0_i32_5 = arith.constant 0 : i32
    %14 = vector.broadcast %c0_i32_5 : i32 to vector<8x256xi32>
    %15 = arith.cmpi ne, %13, %14 : vector<8x256xi32>
    %cst_6 = arith.constant 1.000000e+00 : f32
    %cst_7 = arith.constant -1.000000e+00 : f32
    %16 = vector.broadcast %cst_6 : f32 to vector<8x256xf32>
    %17 = vector.broadcast %cst_7 : f32 to vector<8x256xf32>
    %18 = arith.select %15, %16, %17 : vector<8x256xi1>, vector<8x256xf32>
    %c2_i32 = arith.constant 2 : i32
    %19 = vector.broadcast %c2_i32 : i32 to vector<8x256xi32>
    %20 = arith.shrui %0, %19 : vector<8x256xi32>
    %c1_i32_8 = arith.constant 1 : i32
    %21 = vector.broadcast %c1_i32_8 : i32 to vector<8x256xi32>
    %22 = arith.andi %20, %21 : vector<8x256xi32>
    %c0_i32_9 = arith.constant 0 : i32
    %23 = vector.broadcast %c0_i32_9 : i32 to vector<8x256xi32>
    %24 = arith.cmpi ne, %22, %23 : vector<8x256xi32>
    %cst_10 = arith.constant 1.000000e+00 : f32
    %cst_11 = arith.constant -1.000000e+00 : f32
    %25 = vector.broadcast %cst_10 : f32 to vector<8x256xf32>
    %26 = vector.broadcast %cst_11 : f32 to vector<8x256xf32>
    %27 = arith.select %24, %25, %26 : vector<8x256xi1>, vector<8x256xf32>
    %c3_i32 = arith.constant 3 : i32
    %28 = vector.broadcast %c3_i32 : i32 to vector<8x256xi32>
    %29 = arith.shrui %0, %28 : vector<8x256xi32>
    %c1_i32_12 = arith.constant 1 : i32
    %30 = vector.broadcast %c1_i32_12 : i32 to vector<8x256xi32>
    %31 = arith.andi %29, %30 : vector<8x256xi32>
    %c0_i32_13 = arith.constant 0 : i32
    %32 = vector.broadcast %c0_i32_13 : i32 to vector<8x256xi32>
    %33 = arith.cmpi ne, %31, %32 : vector<8x256xi32>
    %cst_14 = arith.constant 1.000000e+00 : f32
    %cst_15 = arith.constant -1.000000e+00 : f32
    %34 = vector.broadcast %cst_14 : f32 to vector<8x256xf32>
    %35 = vector.broadcast %cst_15 : f32 to vector<8x256xf32>
    %36 = arith.select %33, %34, %35 : vector<8x256xi1>, vector<8x256xf32>
    %c4_i32 = arith.constant 4 : i32
    %37 = vector.broadcast %c4_i32 : i32 to vector<8x256xi32>
    %38 = arith.shrui %0, %37 : vector<8x256xi32>
    %c1_i32_16 = arith.constant 1 : i32
    %39 = vector.broadcast %c1_i32_16 : i32 to vector<8x256xi32>
    %40 = arith.andi %38, %39 : vector<8x256xi32>
    %c0_i32_17 = arith.constant 0 : i32
    %41 = vector.broadcast %c0_i32_17 : i32 to vector<8x256xi32>
    %42 = arith.cmpi ne, %40, %41 : vector<8x256xi32>
    %cst_18 = arith.constant 1.000000e+00 : f32
    %cst_19 = arith.constant -1.000000e+00 : f32
    %43 = vector.broadcast %cst_18 : f32 to vector<8x256xf32>
    %44 = vector.broadcast %cst_19 : f32 to vector<8x256xf32>
    %45 = arith.select %42, %43, %44 : vector<8x256xi1>, vector<8x256xf32>
    %c5_i32 = arith.constant 5 : i32
    %46 = vector.broadcast %c5_i32 : i32 to vector<8x256xi32>
    %47 = arith.shrui %0, %46 : vector<8x256xi32>
    %c1_i32_20 = arith.constant 1 : i32
    %48 = vector.broadcast %c1_i32_20 : i32 to vector<8x256xi32>
    %49 = arith.andi %47, %48 : vector<8x256xi32>
    %c0_i32_21 = arith.constant 0 : i32
    %50 = vector.broadcast %c0_i32_21 : i32 to vector<8x256xi32>
    %51 = arith.cmpi ne, %49, %50 : vector<8x256xi32>
    %cst_22 = arith.constant 1.000000e+00 : f32
    %cst_23 = arith.constant -1.000000e+00 : f32
    %52 = vector.broadcast %cst_22 : f32 to vector<8x256xf32>
    %53 = vector.broadcast %cst_23 : f32 to vector<8x256xf32>
    %54 = arith.select %51, %52, %53 : vector<8x256xi1>, vector<8x256xf32>
    %c6_i32 = arith.constant 6 : i32
    %55 = vector.broadcast %c6_i32 : i32 to vector<8x256xi32>
    %56 = arith.shrui %0, %55 : vector<8x256xi32>
    %c1_i32_24 = arith.constant 1 : i32
    %57 = vector.broadcast %c1_i32_24 : i32 to vector<8x256xi32>
    %58 = arith.andi %56, %57 : vector<8x256xi32>
    %c0_i32_25 = arith.constant 0 : i32
    %59 = vector.broadcast %c0_i32_25 : i32 to vector<8x256xi32>
    %60 = arith.cmpi ne, %58, %59 : vector<8x256xi32>
    %cst_26 = arith.constant 1.000000e+00 : f32
    %cst_27 = arith.constant -1.000000e+00 : f32
    %61 = vector.broadcast %cst_26 : f32 to vector<8x256xf32>
    %62 = vector.broadcast %cst_27 : f32 to vector<8x256xf32>
    %63 = arith.select %60, %61, %62 : vector<8x256xi1>, vector<8x256xf32>
    %c7_i32 = arith.constant 7 : i32
    %64 = vector.broadcast %c7_i32 : i32 to vector<8x256xi32>
    %65 = arith.shrui %0, %64 : vector<8x256xi32>
    %c1_i32_28 = arith.constant 1 : i32
    %66 = vector.broadcast %c1_i32_28 : i32 to vector<8x256xi32>
    %67 = arith.andi %65, %66 : vector<8x256xi32>
    %c0_i32_29 = arith.constant 0 : i32
    %68 = vector.broadcast %c0_i32_29 : i32 to vector<8x256xi32>
    %69 = arith.cmpi ne, %67, %68 : vector<8x256xi32>
    %cst_30 = arith.constant 1.000000e+00 : f32
    %cst_31 = arith.constant -1.000000e+00 : f32
    %70 = vector.broadcast %cst_30 : f32 to vector<8x256xf32>
    %71 = vector.broadcast %cst_31 : f32 to vector<8x256xf32>
    %72 = arith.select %69, %70, %71 : vector<8x256xi1>, vector<8x256xf32>
    %c8_i32 = arith.constant 8 : i32
    %73 = vector.broadcast %c8_i32 : i32 to vector<8x256xi32>
    %74 = arith.shrui %0, %73 : vector<8x256xi32>
    %c1_i32_32 = arith.constant 1 : i32
    %75 = vector.broadcast %c1_i32_32 : i32 to vector<8x256xi32>
    %76 = arith.andi %74, %75 : vector<8x256xi32>
    %c0_i32_33 = arith.constant 0 : i32
    %77 = vector.broadcast %c0_i32_33 : i32 to vector<8x256xi32>
    %78 = arith.cmpi ne, %76, %77 : vector<8x256xi32>
    %cst_34 = arith.constant 1.000000e+00 : f32
    %cst_35 = arith.constant -1.000000e+00 : f32
    %79 = vector.broadcast %cst_34 : f32 to vector<8x256xf32>
    %80 = vector.broadcast %cst_35 : f32 to vector<8x256xf32>
    %81 = arith.select %78, %79, %80 : vector<8x256xi1>, vector<8x256xf32>
    %c9_i32 = arith.constant 9 : i32
    %82 = vector.broadcast %c9_i32 : i32 to vector<8x256xi32>
    %83 = arith.shrui %0, %82 : vector<8x256xi32>
    %c1_i32_36 = arith.constant 1 : i32
    %84 = vector.broadcast %c1_i32_36 : i32 to vector<8x256xi32>
    %85 = arith.andi %83, %84 : vector<8x256xi32>
    %c0_i32_37 = arith.constant 0 : i32
    %86 = vector.broadcast %c0_i32_37 : i32 to vector<8x256xi32>
    %87 = arith.cmpi ne, %85, %86 : vector<8x256xi32>
    %cst_38 = arith.constant 1.000000e+00 : f32
    %cst_39 = arith.constant -1.000000e+00 : f32
    %88 = vector.broadcast %cst_38 : f32 to vector<8x256xf32>
    %89 = vector.broadcast %cst_39 : f32 to vector<8x256xf32>
    %90 = arith.select %87, %88, %89 : vector<8x256xi1>, vector<8x256xf32>
    %c10_i32 = arith.constant 10 : i32
    %91 = vector.broadcast %c10_i32 : i32 to vector<8x256xi32>
    %92 = arith.shrui %0, %91 : vector<8x256xi32>
    %c1_i32_40 = arith.constant 1 : i32
    %93 = vector.broadcast %c1_i32_40 : i32 to vector<8x256xi32>
    %94 = arith.andi %92, %93 : vector<8x256xi32>
    %c0_i32_41 = arith.constant 0 : i32
    %95 = vector.broadcast %c0_i32_41 : i32 to vector<8x256xi32>
    %96 = arith.cmpi ne, %94, %95 : vector<8x256xi32>
    %cst_42 = arith.constant 1.000000e+00 : f32
    %cst_43 = arith.constant -1.000000e+00 : f32
    %97 = vector.broadcast %cst_42 : f32 to vector<8x256xf32>
    %98 = vector.broadcast %cst_43 : f32 to vector<8x256xf32>
    %99 = arith.select %96, %97, %98 : vector<8x256xi1>, vector<8x256xf32>
    %c11_i32 = arith.constant 11 : i32
    %100 = vector.broadcast %c11_i32 : i32 to vector<8x256xi32>
    %101 = arith.shrui %0, %100 : vector<8x256xi32>
    %c1_i32_44 = arith.constant 1 : i32
    %102 = vector.broadcast %c1_i32_44 : i32 to vector<8x256xi32>
    %103 = arith.andi %101, %102 : vector<8x256xi32>
    %c0_i32_45 = arith.constant 0 : i32
    %104 = vector.broadcast %c0_i32_45 : i32 to vector<8x256xi32>
    %105 = arith.cmpi ne, %103, %104 : vector<8x256xi32>
    %cst_46 = arith.constant 1.000000e+00 : f32
    %cst_47 = arith.constant -1.000000e+00 : f32
    %106 = vector.broadcast %cst_46 : f32 to vector<8x256xf32>
    %107 = vector.broadcast %cst_47 : f32 to vector<8x256xf32>
    %108 = arith.select %105, %106, %107 : vector<8x256xi1>, vector<8x256xf32>
    %c12_i32 = arith.constant 12 : i32
    %109 = vector.broadcast %c12_i32 : i32 to vector<8x256xi32>
    %110 = arith.shrui %0, %109 : vector<8x256xi32>
    %c1_i32_48 = arith.constant 1 : i32
    %111 = vector.broadcast %c1_i32_48 : i32 to vector<8x256xi32>
    %112 = arith.andi %110, %111 : vector<8x256xi32>
    %c0_i32_49 = arith.constant 0 : i32
    %113 = vector.broadcast %c0_i32_49 : i32 to vector<8x256xi32>
    %114 = arith.cmpi ne, %112, %113 : vector<8x256xi32>
    %cst_50 = arith.constant 1.000000e+00 : f32
    %cst_51 = arith.constant -1.000000e+00 : f32
    %115 = vector.broadcast %cst_50 : f32 to vector<8x256xf32>
    %116 = vector.broadcast %cst_51 : f32 to vector<8x256xf32>
    %117 = arith.select %114, %115, %116 : vector<8x256xi1>, vector<8x256xf32>
    %c13_i32 = arith.constant 13 : i32
    %118 = vector.broadcast %c13_i32 : i32 to vector<8x256xi32>
    %119 = arith.shrui %0, %118 : vector<8x256xi32>
    %c1_i32_52 = arith.constant 1 : i32
    %120 = vector.broadcast %c1_i32_52 : i32 to vector<8x256xi32>
    %121 = arith.andi %119, %120 : vector<8x256xi32>
    %c0_i32_53 = arith.constant 0 : i32
    %122 = vector.broadcast %c0_i32_53 : i32 to vector<8x256xi32>
    %123 = arith.cmpi ne, %121, %122 : vector<8x256xi32>
    %cst_54 = arith.constant 1.000000e+00 : f32
    %cst_55 = arith.constant -1.000000e+00 : f32
    %124 = vector.broadcast %cst_54 : f32 to vector<8x256xf32>
    %125 = vector.broadcast %cst_55 : f32 to vector<8x256xf32>
    %126 = arith.select %123, %124, %125 : vector<8x256xi1>, vector<8x256xf32>
    %c14_i32 = arith.constant 14 : i32
    %127 = vector.broadcast %c14_i32 : i32 to vector<8x256xi32>
    %128 = arith.shrui %0, %127 : vector<8x256xi32>
    %c1_i32_56 = arith.constant 1 : i32
    %129 = vector.broadcast %c1_i32_56 : i32 to vector<8x256xi32>
    %130 = arith.andi %128, %129 : vector<8x256xi32>
    %c0_i32_57 = arith.constant 0 : i32
    %131 = vector.broadcast %c0_i32_57 : i32 to vector<8x256xi32>
    %132 = arith.cmpi ne, %130, %131 : vector<8x256xi32>
    %cst_58 = arith.constant 1.000000e+00 : f32
    %cst_59 = arith.constant -1.000000e+00 : f32
    %133 = vector.broadcast %cst_58 : f32 to vector<8x256xf32>
    %134 = vector.broadcast %cst_59 : f32 to vector<8x256xf32>
    %135 = arith.select %132, %133, %134 : vector<8x256xi1>, vector<8x256xf32>
    %c15_i32 = arith.constant 15 : i32
    %136 = vector.broadcast %c15_i32 : i32 to vector<8x256xi32>
    %137 = arith.shrui %0, %136 : vector<8x256xi32>
    %c1_i32_60 = arith.constant 1 : i32
    %138 = vector.broadcast %c1_i32_60 : i32 to vector<8x256xi32>
    %139 = arith.andi %137, %138 : vector<8x256xi32>
    %c0_i32_61 = arith.constant 0 : i32
    %140 = vector.broadcast %c0_i32_61 : i32 to vector<8x256xi32>
    %141 = arith.cmpi ne, %139, %140 : vector<8x256xi32>
    %cst_62 = arith.constant 1.000000e+00 : f32
    %cst_63 = arith.constant -1.000000e+00 : f32
    %142 = vector.broadcast %cst_62 : f32 to vector<8x256xf32>
    %143 = vector.broadcast %cst_63 : f32 to vector<8x256xf32>
    %144 = arith.select %141, %142, %143 : vector<8x256xi1>, vector<8x256xf32>
    %c16_i32 = arith.constant 16 : i32
    %145 = vector.broadcast %c16_i32 : i32 to vector<8x256xi32>
    %146 = arith.shrui %0, %145 : vector<8x256xi32>
    %c1_i32_64 = arith.constant 1 : i32
    %147 = vector.broadcast %c1_i32_64 : i32 to vector<8x256xi32>
    %148 = arith.andi %146, %147 : vector<8x256xi32>
    %c0_i32_65 = arith.constant 0 : i32
    %149 = vector.broadcast %c0_i32_65 : i32 to vector<8x256xi32>
    %150 = arith.cmpi ne, %148, %149 : vector<8x256xi32>
    %cst_66 = arith.constant 1.000000e+00 : f32
    %cst_67 = arith.constant -1.000000e+00 : f32
    %151 = vector.broadcast %cst_66 : f32 to vector<8x256xf32>
    %152 = vector.broadcast %cst_67 : f32 to vector<8x256xf32>
    %153 = arith.select %150, %151, %152 : vector<8x256xi1>, vector<8x256xf32>
    %c17_i32 = arith.constant 17 : i32
    %154 = vector.broadcast %c17_i32 : i32 to vector<8x256xi32>
    %155 = arith.shrui %0, %154 : vector<8x256xi32>
    %c1_i32_68 = arith.constant 1 : i32
    %156 = vector.broadcast %c1_i32_68 : i32 to vector<8x256xi32>
    %157 = arith.andi %155, %156 : vector<8x256xi32>
    %c0_i32_69 = arith.constant 0 : i32
    %158 = vector.broadcast %c0_i32_69 : i32 to vector<8x256xi32>
    %159 = arith.cmpi ne, %157, %158 : vector<8x256xi32>
    %cst_70 = arith.constant 1.000000e+00 : f32
    %cst_71 = arith.constant -1.000000e+00 : f32
    %160 = vector.broadcast %cst_70 : f32 to vector<8x256xf32>
    %161 = vector.broadcast %cst_71 : f32 to vector<8x256xf32>
    %162 = arith.select %159, %160, %161 : vector<8x256xi1>, vector<8x256xf32>
    %c18_i32 = arith.constant 18 : i32
    %163 = vector.broadcast %c18_i32 : i32 to vector<8x256xi32>
    %164 = arith.shrui %0, %163 : vector<8x256xi32>
    %c1_i32_72 = arith.constant 1 : i32
    %165 = vector.broadcast %c1_i32_72 : i32 to vector<8x256xi32>
    %166 = arith.andi %164, %165 : vector<8x256xi32>
    %c0_i32_73 = arith.constant 0 : i32
    %167 = vector.broadcast %c0_i32_73 : i32 to vector<8x256xi32>
    %168 = arith.cmpi ne, %166, %167 : vector<8x256xi32>
    %cst_74 = arith.constant 1.000000e+00 : f32
    %cst_75 = arith.constant -1.000000e+00 : f32
    %169 = vector.broadcast %cst_74 : f32 to vector<8x256xf32>
    %170 = vector.broadcast %cst_75 : f32 to vector<8x256xf32>
    %171 = arith.select %168, %169, %170 : vector<8x256xi1>, vector<8x256xf32>
    %c19_i32 = arith.constant 19 : i32
    %172 = vector.broadcast %c19_i32 : i32 to vector<8x256xi32>
    %173 = arith.shrui %0, %172 : vector<8x256xi32>
    %c1_i32_76 = arith.constant 1 : i32
    %174 = vector.broadcast %c1_i32_76 : i32 to vector<8x256xi32>
    %175 = arith.andi %173, %174 : vector<8x256xi32>
    %c0_i32_77 = arith.constant 0 : i32
    %176 = vector.broadcast %c0_i32_77 : i32 to vector<8x256xi32>
    %177 = arith.cmpi ne, %175, %176 : vector<8x256xi32>
    %cst_78 = arith.constant 1.000000e+00 : f32
    %cst_79 = arith.constant -1.000000e+00 : f32
    %178 = vector.broadcast %cst_78 : f32 to vector<8x256xf32>
    %179 = vector.broadcast %cst_79 : f32 to vector<8x256xf32>
    %180 = arith.select %177, %178, %179 : vector<8x256xi1>, vector<8x256xf32>
    %c20_i32 = arith.constant 20 : i32
    %181 = vector.broadcast %c20_i32 : i32 to vector<8x256xi32>
    %182 = arith.shrui %0, %181 : vector<8x256xi32>
    %c1_i32_80 = arith.constant 1 : i32
    %183 = vector.broadcast %c1_i32_80 : i32 to vector<8x256xi32>
    %184 = arith.andi %182, %183 : vector<8x256xi32>
    %c0_i32_81 = arith.constant 0 : i32
    %185 = vector.broadcast %c0_i32_81 : i32 to vector<8x256xi32>
    %186 = arith.cmpi ne, %184, %185 : vector<8x256xi32>
    %cst_82 = arith.constant 1.000000e+00 : f32
    %cst_83 = arith.constant -1.000000e+00 : f32
    %187 = vector.broadcast %cst_82 : f32 to vector<8x256xf32>
    %188 = vector.broadcast %cst_83 : f32 to vector<8x256xf32>
    %189 = arith.select %186, %187, %188 : vector<8x256xi1>, vector<8x256xf32>
    %c21_i32 = arith.constant 21 : i32
    %190 = vector.broadcast %c21_i32 : i32 to vector<8x256xi32>
    %191 = arith.shrui %0, %190 : vector<8x256xi32>
    %c1_i32_84 = arith.constant 1 : i32
    %192 = vector.broadcast %c1_i32_84 : i32 to vector<8x256xi32>
    %193 = arith.andi %191, %192 : vector<8x256xi32>
    %c0_i32_85 = arith.constant 0 : i32
    %194 = vector.broadcast %c0_i32_85 : i32 to vector<8x256xi32>
    %195 = arith.cmpi ne, %193, %194 : vector<8x256xi32>
    %cst_86 = arith.constant 1.000000e+00 : f32
    %cst_87 = arith.constant -1.000000e+00 : f32
    %196 = vector.broadcast %cst_86 : f32 to vector<8x256xf32>
    %197 = vector.broadcast %cst_87 : f32 to vector<8x256xf32>
    %198 = arith.select %195, %196, %197 : vector<8x256xi1>, vector<8x256xf32>
    %c22_i32 = arith.constant 22 : i32
    %199 = vector.broadcast %c22_i32 : i32 to vector<8x256xi32>
    %200 = arith.shrui %0, %199 : vector<8x256xi32>
    %c1_i32_88 = arith.constant 1 : i32
    %201 = vector.broadcast %c1_i32_88 : i32 to vector<8x256xi32>
    %202 = arith.andi %200, %201 : vector<8x256xi32>
    %c0_i32_89 = arith.constant 0 : i32
    %203 = vector.broadcast %c0_i32_89 : i32 to vector<8x256xi32>
    %204 = arith.cmpi ne, %202, %203 : vector<8x256xi32>
    %cst_90 = arith.constant 1.000000e+00 : f32
    %cst_91 = arith.constant -1.000000e+00 : f32
    %205 = vector.broadcast %cst_90 : f32 to vector<8x256xf32>
    %206 = vector.broadcast %cst_91 : f32 to vector<8x256xf32>
    %207 = arith.select %204, %205, %206 : vector<8x256xi1>, vector<8x256xf32>
    %c23_i32 = arith.constant 23 : i32
    %208 = vector.broadcast %c23_i32 : i32 to vector<8x256xi32>
    %209 = arith.shrui %0, %208 : vector<8x256xi32>
    %c1_i32_92 = arith.constant 1 : i32
    %210 = vector.broadcast %c1_i32_92 : i32 to vector<8x256xi32>
    %211 = arith.andi %209, %210 : vector<8x256xi32>
    %c0_i32_93 = arith.constant 0 : i32
    %212 = vector.broadcast %c0_i32_93 : i32 to vector<8x256xi32>
    %213 = arith.cmpi ne, %211, %212 : vector<8x256xi32>
    %cst_94 = arith.constant 1.000000e+00 : f32
    %cst_95 = arith.constant -1.000000e+00 : f32
    %214 = vector.broadcast %cst_94 : f32 to vector<8x256xf32>
    %215 = vector.broadcast %cst_95 : f32 to vector<8x256xf32>
    %216 = arith.select %213, %214, %215 : vector<8x256xi1>, vector<8x256xf32>
    %c24_i32 = arith.constant 24 : i32
    %217 = vector.broadcast %c24_i32 : i32 to vector<8x256xi32>
    %218 = arith.shrui %0, %217 : vector<8x256xi32>
    %c1_i32_96 = arith.constant 1 : i32
    %219 = vector.broadcast %c1_i32_96 : i32 to vector<8x256xi32>
    %220 = arith.andi %218, %219 : vector<8x256xi32>
    %c0_i32_97 = arith.constant 0 : i32
    %221 = vector.broadcast %c0_i32_97 : i32 to vector<8x256xi32>
    %222 = arith.cmpi ne, %220, %221 : vector<8x256xi32>
    %cst_98 = arith.constant 1.000000e+00 : f32
    %cst_99 = arith.constant -1.000000e+00 : f32
    %223 = vector.broadcast %cst_98 : f32 to vector<8x256xf32>
    %224 = vector.broadcast %cst_99 : f32 to vector<8x256xf32>
    %225 = arith.select %222, %223, %224 : vector<8x256xi1>, vector<8x256xf32>
    %c25_i32 = arith.constant 25 : i32
    %226 = vector.broadcast %c25_i32 : i32 to vector<8x256xi32>
    %227 = arith.shrui %0, %226 : vector<8x256xi32>
    %c1_i32_100 = arith.constant 1 : i32
    %228 = vector.broadcast %c1_i32_100 : i32 to vector<8x256xi32>
    %229 = arith.andi %227, %228 : vector<8x256xi32>
    %c0_i32_101 = arith.constant 0 : i32
    %230 = vector.broadcast %c0_i32_101 : i32 to vector<8x256xi32>
    %231 = arith.cmpi ne, %229, %230 : vector<8x256xi32>
    %cst_102 = arith.constant 1.000000e+00 : f32
    %cst_103 = arith.constant -1.000000e+00 : f32
    %232 = vector.broadcast %cst_102 : f32 to vector<8x256xf32>
    %233 = vector.broadcast %cst_103 : f32 to vector<8x256xf32>
    %234 = arith.select %231, %232, %233 : vector<8x256xi1>, vector<8x256xf32>
    %c26_i32 = arith.constant 26 : i32
    %235 = vector.broadcast %c26_i32 : i32 to vector<8x256xi32>
    %236 = arith.shrui %0, %235 : vector<8x256xi32>
    %c1_i32_104 = arith.constant 1 : i32
    %237 = vector.broadcast %c1_i32_104 : i32 to vector<8x256xi32>
    %238 = arith.andi %236, %237 : vector<8x256xi32>
    %c0_i32_105 = arith.constant 0 : i32
    %239 = vector.broadcast %c0_i32_105 : i32 to vector<8x256xi32>
    %240 = arith.cmpi ne, %238, %239 : vector<8x256xi32>
    %cst_106 = arith.constant 1.000000e+00 : f32
    %cst_107 = arith.constant -1.000000e+00 : f32
    %241 = vector.broadcast %cst_106 : f32 to vector<8x256xf32>
    %242 = vector.broadcast %cst_107 : f32 to vector<8x256xf32>
    %243 = arith.select %240, %241, %242 : vector<8x256xi1>, vector<8x256xf32>
    %c27_i32 = arith.constant 27 : i32
    %244 = vector.broadcast %c27_i32 : i32 to vector<8x256xi32>
    %245 = arith.shrui %0, %244 : vector<8x256xi32>
    %c1_i32_108 = arith.constant 1 : i32
    %246 = vector.broadcast %c1_i32_108 : i32 to vector<8x256xi32>
    %247 = arith.andi %245, %246 : vector<8x256xi32>
    %c0_i32_109 = arith.constant 0 : i32
    %248 = vector.broadcast %c0_i32_109 : i32 to vector<8x256xi32>
    %249 = arith.cmpi ne, %247, %248 : vector<8x256xi32>
    %cst_110 = arith.constant 1.000000e+00 : f32
    %cst_111 = arith.constant -1.000000e+00 : f32
    %250 = vector.broadcast %cst_110 : f32 to vector<8x256xf32>
    %251 = vector.broadcast %cst_111 : f32 to vector<8x256xf32>
    %252 = arith.select %249, %250, %251 : vector<8x256xi1>, vector<8x256xf32>
    %c28_i32 = arith.constant 28 : i32
    %253 = vector.broadcast %c28_i32 : i32 to vector<8x256xi32>
    %254 = arith.shrui %0, %253 : vector<8x256xi32>
    %c1_i32_112 = arith.constant 1 : i32
    %255 = vector.broadcast %c1_i32_112 : i32 to vector<8x256xi32>
    %256 = arith.andi %254, %255 : vector<8x256xi32>
    %c0_i32_113 = arith.constant 0 : i32
    %257 = vector.broadcast %c0_i32_113 : i32 to vector<8x256xi32>
    %258 = arith.cmpi ne, %256, %257 : vector<8x256xi32>
    %cst_114 = arith.constant 1.000000e+00 : f32
    %cst_115 = arith.constant -1.000000e+00 : f32
    %259 = vector.broadcast %cst_114 : f32 to vector<8x256xf32>
    %260 = vector.broadcast %cst_115 : f32 to vector<8x256xf32>
    %261 = arith.select %258, %259, %260 : vector<8x256xi1>, vector<8x256xf32>
    %c29_i32 = arith.constant 29 : i32
    %262 = vector.broadcast %c29_i32 : i32 to vector<8x256xi32>
    %263 = arith.shrui %0, %262 : vector<8x256xi32>
    %c1_i32_116 = arith.constant 1 : i32
    %264 = vector.broadcast %c1_i32_116 : i32 to vector<8x256xi32>
    %265 = arith.andi %263, %264 : vector<8x256xi32>
    %c0_i32_117 = arith.constant 0 : i32
    %266 = vector.broadcast %c0_i32_117 : i32 to vector<8x256xi32>
    %267 = arith.cmpi ne, %265, %266 : vector<8x256xi32>
    %cst_118 = arith.constant 1.000000e+00 : f32
    %cst_119 = arith.constant -1.000000e+00 : f32
    %268 = vector.broadcast %cst_118 : f32 to vector<8x256xf32>
    %269 = vector.broadcast %cst_119 : f32 to vector<8x256xf32>
    %270 = arith.select %267, %268, %269 : vector<8x256xi1>, vector<8x256xf32>
    %c30_i32 = arith.constant 30 : i32
    %271 = vector.broadcast %c30_i32 : i32 to vector<8x256xi32>
    %272 = arith.shrui %0, %271 : vector<8x256xi32>
    %c1_i32_120 = arith.constant 1 : i32
    %273 = vector.broadcast %c1_i32_120 : i32 to vector<8x256xi32>
    %274 = arith.andi %272, %273 : vector<8x256xi32>
    %c0_i32_121 = arith.constant 0 : i32
    %275 = vector.broadcast %c0_i32_121 : i32 to vector<8x256xi32>
    %276 = arith.cmpi ne, %274, %275 : vector<8x256xi32>
    %cst_122 = arith.constant 1.000000e+00 : f32
    %cst_123 = arith.constant -1.000000e+00 : f32
    %277 = vector.broadcast %cst_122 : f32 to vector<8x256xf32>
    %278 = vector.broadcast %cst_123 : f32 to vector<8x256xf32>
    %279 = arith.select %276, %277, %278 : vector<8x256xi1>, vector<8x256xf32>
    %c31_i32 = arith.constant 31 : i32
    %280 = vector.broadcast %c31_i32 : i32 to vector<8x256xi32>
    %281 = arith.shrui %0, %280 : vector<8x256xi32>
    %c1_i32_124 = arith.constant 1 : i32
    %282 = vector.broadcast %c1_i32_124 : i32 to vector<8x256xi32>
    %283 = arith.andi %281, %282 : vector<8x256xi32>
    %c0_i32_125 = arith.constant 0 : i32
    %284 = vector.broadcast %c0_i32_125 : i32 to vector<8x256xi32>
    %285 = arith.cmpi ne, %283, %284 : vector<8x256xi32>
    %cst_126 = arith.constant 1.000000e+00 : f32
    %cst_127 = arith.constant -1.000000e+00 : f32
    %286 = vector.broadcast %cst_126 : f32 to vector<8x256xf32>
    %287 = vector.broadcast %cst_127 : f32 to vector<8x256xf32>
    %288 = arith.select %285, %286, %287 : vector<8x256xi1>, vector<8x256xf32>
    %289 = tpu.concatenate %9, %18, %27, %36, %45, %54, %63, %72, %81, %90, %99, %108, %117, %126, %135, %144 in 0 : vector<8x256xf32>, vector<8x256xf32>, vector<8x256xf32>, vector<8x256xf32>, vector<8x256xf32>, vector<8x256xf32>, vector<8x256xf32>, vector<8x256xf32>, vector<8x256xf32>, vector<8x256xf32>, vector<8x256xf32>, vector<8x256xf32>, vector<8x256xf32>, vector<8x256xf32>, vector<8x256xf32>, vector<8x256xf32> -> vector<128x256xf32>
    %290 = tpu.concatenate %153, %162, %171, %180, %189, %198, %207, %216, %225, %234, %243, %252, %261, %270, %279, %288 in 0 : vector<8x256xf32>, vector<8x256xf32>, vector<8x256xf32>, vector<8x256xf32>, vector<8x256xf32>, vector<8x256xf32>, vector<8x256xf32>, vector<8x256xf32>, vector<8x256xf32>, vector<8x256xf32>, vector<8x256xf32>, vector<8x256xf32>, vector<8x256xf32>, vector<8x256xf32>, vector<8x256xf32>, vector<8x256xf32> -> vector<128x256xf32>
    %291 = tpu.concatenate %289, %290 in 0 : vector<128x256xf32>, vector<128x256xf32> -> vector<256x256xf32>
    %c0_128 = arith.constant 0 : index
    %c0_129 = arith.constant 0 : index
    %292 = vector.load %arg2[%c0_128, %c0_129] : memref<8x256xf32, #tpu.memory_space<vmem>>, vector<8x256xf32>
    %cst_130 = arith.constant dense<0.000000e+00> : vector<8x256xf32>
    %293 = tpu.matmul %292, %291, %cst_130 {dimension_numbers = #tpu.dot_dimension_numbers<[1], [0], [0], [1], [0, 0, 1, 1], [], []>} : vector<8x256xf32>, vector<256x256xf32>, vector<8x256xf32> -> vector<8x256xf32>
    %cst_131 = arith.constant 0.000000e+00 : f32
    %294 = vector.broadcast %cst_131 : f32 to vector<8x256xf32>
    %295 = arith.cmpf ogt, %293, %294 : vector<8x256xf32>
    %c1_i32_132 = arith.constant 1 : i32
    %c-1_i32 = arith.constant -1 : i32
    %296 = vector.broadcast %c1_i32_132 : i32 to vector<8x256xi32>
    %297 = vector.broadcast %c-1_i32 : i32 to vector<8x256xi32>
    %298 = arith.select %295, %296, %297 : vector<8x256xi1>, vector<8x256xi32>
    %c0_133 = arith.constant 0 : index
    %c0_134 = arith.constant 0 : index
    %299 = vector.load %arg4[%c0_133, %c0_134] : memref<8x256xi32, #tpu.memory_space<vmem>>, vector<8x256xi32>
    tpu.vector_store %arg4[%c0_133, %c0_134], %298 {strides = array<i32>} : memref<8x256xi32, #tpu.memory_space<vmem>>, vector<8x256xi32>,
    return
  }
  func.func @transform_0(%arg0: i32, %arg1: i32) -> (i32, i32) {
    %c0_i32 = arith.constant 0 : i32
    %c0_i32_0 = arith.constant 0 : i32
    return %arg0, %c0_i32 : i32, i32
  }
  func.func @transform_1(%arg0: i32, %arg1: i32) -> (i32, i32) {
    %c0_i32 = arith.constant 0 : i32
    %c0_i32_0 = arith.constant 0 : i32
    return %c0_i32, %arg1 : i32, i32
  }
  func.func @transform_2(%arg0: i32, %arg1: i32) -> (i32, i32) {
    %c0_i32 = arith.constant 0 : i32
    return %arg0, %arg1 : i32, i32
  }
}

</mosaic_0001>

<bundles_post_ra>
// kernel: tpu_custom_call.1
= control target key start
LH: loop header
LB: loop body
LE: loop exit
PB: predicated region body
PF: predicated region fallthrough
CT: control target
= control target key end

     0   :  { %7 = vsyncpa [#allocation3], 0  ;;  %s1322_s0 = inlined_call_operand.hbm [shape: f32[8,256], index: 0, kind: input, shape index: {}]   ;;  %s1323_s1 = inlined_call_operand.hbm [shape: u32[8,512], index: 1, kind: input, shape index: {}]   ;;  %s1324_s2 = inlined_call_operand.hbm [shape: s32[8,512], index: 2, kind: output, shape index: {}]  }
   0x1   :  { %8 = vsyncpa [#allocation6], 0 }
   0x2   :  { %10 = vsyncpa [#allocation6 + $0x1], 0 }
   0x3   :  { %11 = vsyncpa [#allocation4], 0 }
   0x4   :  { %13 = vsyncpa [#allocation4 + $0x1], 0  ;;  %s970_s9 = smov 0   ;;  %s972_s10 = smov 0  }
   0x5   :  { %s974_s11 = smov 0   ;;  %s976_s12 = smov 0  }
   0x6   :  { %s978_s13 = smov 0   ;;  %s980_s14 = smov 0  }
   0x7 LB: > { %s644_s15 = sadd.s32 4294967295, %s948_s14   ;;  %s645_s16 = sadd.s32 4294967294, %s948_s14   ;;  %s948_s14 = sphi %s980_s14, %s19_s14   ;;  %s944_s13 = sphi %s978_s13, %s1349_s13   ;;  %s940_s12 = sphi %s976_s12, %s1348_s12   ;;  %s936_s11 = sphi %s974_s11, %s1347_s11   ;;  %s932_s10 = sphi %s972_s10, %s1346_s10   ;;  %s928_s9 = sphi %s970_s9, %s1345_s9  }
   0x8   : > { %p77_p0 = scmp.ne.s32.totalorder %s932_s10, %s928_s9  ;;  %p1004_p1 = scmp.eq.s32.totalorder %s644_s15, 0 }
   0x9   : > { %p1008_p2 = scmp.eq.s32.totalorder %s644_s15, 1  ;;  %p109_p3 = scmp.eq.s32.totalorder %s645_s16, 1 }
   0xa   : > { %s1329_s17 = scalar_select %p1004_p1, 1, 0 }
   0xb   : > { %s1330_s18 = scalar_select %p1008_p2, 1, 0 }
   0xc   : > { %p1014_p4 = por %p1004_p1, %p77_p0  ;;  %p646_p5 = scmp.ge.s32.totalorder %s948_s14, 1 }
   0xd   : > { %p1019_p6 = por %p109_p3, %p77_p0  ;;  %p116_p7 = scmp.lt.s32.totalorder %s948_s14, 3 }
   0xe   : > { %s1331_s19 = scalar_select %p1014_p4, 1, 0 }
   0xf   : > { %s1332_s20 = scalar_select %p1019_p6, 1, 0 }
  0x10   : > { %p1024_p8 = pnand %p646_p5, %p116_p7  ;;  %s950_s22 = smov [#allocation2]  }
  0x11   : > { %s132_s23 = sshll.u32 %s950_s22, 4  ;;  %s28_s25 = sadd.s32 1, %s944_s13  ;;  %s133_s23 = int_to_ptr.vmem [resolvable:$true] %s132_s23 }
  0x12   : > { %s1333_s21 = scalar_select %p1024_p8, 1, 0 }
  0x13   : > { %p737_p10 = pneg %p1024_p8  ;;  %s64_s26 = sadd.s32 1, %s936_s11 }
  0x14   : > { %p1039_p12 = scmp.ge.s32.totalorder %s28_s25, 2  ;;  %s804_s30 = scalar_lea.hbm %s1322_s0, 256 }
  0x15   : > { %p1033_p11 = pnand %p737_p10, %p1004_p1  ;;  %p805_p13 = scmp.ne.s32.totalorder %s1322_s0, %s804_s30 }
  0x16   : > { %s1335_s27 = scalar_select %p1039_p12, 1, 0 }
  0x17   : > { %p806_p0 = pneg %p1033_p11  ;;  %p811_p7 = scmp.lt.u32.totalorder %s804_s30, %s1322_s0 }
  0x19   : > { %p807_p3 = pnand %p806_p0, %p805_p13 }
  0x1b   : > { %p808_p5 = pneg %p807_p3 }
  0x1d   : > { %p813_p10 = pnand %p811_p7, %p808_p5 }
  0x1f   : > { %816 = shalt.err (!%p813_p10)
}
  0x20   : > { %s817_s7 = scalar_lea.vmem %s133_s23, 256  ;;  %p825_p1 = scmp.lt.s32.totalorder %s133_s23, %s133_s23 }
  0x21   : > { %p818_p9 = scmp.ne.s32.totalorder %s133_s23, %s817_s7  ;;  %p826_p8 = scmp.lt.s32.totalorder %s817_s7, %s817_s7 }
  0x23   : > { %p820_p6 = pnand %p818_p9, %p806_p0  ;;  %p827_p2 = por %p826_p8, %p825_p1 }
  0x25   : > { %p821_p4 = pneg %p820_p6 }
  0x27   : > { %p828_p12 = pnand %p827_p2, %p821_p4 }
  0x29   : > { %831 = shalt.err (!%p828_p12)
}
  0x2a   : > { %740 = dma.hbm_to_vmem [thread:$0]  (!%p1033_p11), %s1322_s0, 256, %s133_s23, [#allocation3]  }
  0x2b   : > { %p1336_p1 = scmp.ne.s32.totalorder %s1335_s27, 0  ;;  %p71_p2 = scmp.ne.s32.totalorder %s936_s11, %s932_s10 }
  0x2c   : > { %p72_p4 = scmp.eq.s32.totalorder %s948_s14, 0  ;;  %p750_p6 = scmp.lt.s32.totalorder %s948_s14, 2 }
  0x2d   : > { %s1351_s25 = smov (%p1336_p1, %s28_s25), 0  ;;  %p1337_p12 = scmp.ne.s32.totalorder %s1330_s18, 0 }
  0x2e   : > { %s61_s16 = ssub.s32 %s944_s13, %s1351_s25  ;;  %p73_p9 = por %p72_p4, %p71_p2 }
  0x2f   : > { %p62_p8 = scmp.eq.s32.totalorder %s61_s16, 0  ;;  %p1071_p13 = por %p1337_p12, %p71_p2 }
  0x30   : > { %s143_s24 = sand.u32 1, %s936_s11   ;;  %s663_s27 = sshll.u32 %s944_s13, 8 }
  0x31   : > { %s1079_s28 = scalar_select %p62_p8, %s936_s11, %s64_s26  }
  0x32   : > { %s649_s23 = sshll.u32 %s143_s24, 4  ;;  %s1085_s3 = scalar_lea.hbm %s1323_s1, %s663_s27 }
  0x33   : > { %s147_s18 = scalar_lea.vmem [#allocation5], %s649_s23  ;;  %p1089_p11 = pnand %p750_p6, %p73_p9 }
  0x34   : > { %s155_s4 = sshll.u32 %s147_s18, 4  ;;  %s144_s26 = scalar_lea.sflag [#allocation6], %s143_s24  ;;  %s1087_s4 = int_to_ptr.vmem [resolvable:$true] %s155_s4 }
  0x35   : > { %s832_s6 = scalar_lea.hbm %s1085_s3, 256  ;;  %p834_p3 = pneg %p1089_p11 }
  0x36   : > { %p833_p0 = scmp.ne.s32.totalorder %s1085_s3, %s832_s6  ;;  %s837_s15 = scalar_lea.hbm %s1323_s1, 512 }
  0x37   : > { %p838_p10 = scmp.lt.u32.totalorder %s1085_s3, %s1323_s1  ;;  %p839_p1 = scmp.lt.u32.totalorder %s837_s15, %s832_s6 }
  0x38   : > { %p835_p5 = pnand %p834_p3, %p833_p0  ;;  %p841_p4 = scmp.lt.u32.totalorder %s832_s6, %s1085_s3 }
  0x39   : > { %p840_p2 = por %p839_p1, %p838_p10 }
  0x3a   : > { %p836_p7 = pneg %p835_p5 }
  0x3b   : > { %p842_p6 = por %p841_p4, %p840_p2 }
  0x3d   : > { %p843_p8 = pnand %p842_p6, %p836_p7 }
  0x3f   : > { %846 = shalt.err (!%p843_p8)
}
  0x40   : > { %s847_s24 = scalar_lea.vmem %s1087_s4, 256  ;;  %s951_s27 = smov [#allocation5]  }
  0x41   : > { %p848_p9 = scmp.ne.s32.totalorder %s1087_s4, %s847_s24  ;;  %s852_s29 = sshll.u32 %s951_s27, 4  ;;  %s853_s29 = int_to_ptr.vmem [resolvable:$false] %s852_s29 }
  0x42   : > { %s854_s30 = scalar_lea.vmem %s853_s29, 512  ;;  %p855_p5 = scmp.lt.s32.totalorder %s1087_s4, %s853_s29 }
  0x43   : > { %p850_p12 = pnand %p848_p9, %p834_p3  ;;  %p856_p10 = scmp.lt.s32.totalorder %s854_s30, %s847_s24 }
  0x45   : > { %p851_p0 = pneg %p850_p12  ;;  %p857_p1 = por %p856_p10, %p855_p5 }
  0x47   : > { %p858_p2 = pnand %p857_p1, %p851_p0 }
  0x49   : > { %861 = shalt.err (!%p858_p2)
}
  0x4a   : > { %744 = dma.hbm_to_vmem [thread:$0]  (!%p1089_p11), %s1085_s3, 256, %s1087_s4, %s144_s26  }
  0x4b   : > { %p1340_p7 = scmp.ne.s32.totalorder %s1333_s21, 0 }
  0x4c   : > { %p1341_p3 = scmp.ne.s32.totalorder (!%p1340_p7), %s1329_s17, 0 }
  0x4d   : > { %164 = sbr.rel (%p1340_p7) target bundleno = 398 (0x18e), region = 28 }
  0x54   : > { %915 = dma.done.wait (%p1341_p3), [#allocation3], 256  }
  0x55   : > { %917 = vsyncadd (%p1341_p3), [#allocation3], 4294967040  ;;  %s1125_s18 = sand.u32 1, %s932_s10   ;;  %p1342_p11 = scmp.ne.s32.totalorder %s1331_s19, 0 }
  0x56   : > { %s654_s5 = sshll.u32 %s1125_s18, 4  ;;  %s171_s6 = scalar_lea.sflag [#allocation6], %s1125_s18 }
  0x57   : > { %s174_s3 = scalar_lea.vmem [#allocation5], %s654_s5 }
  0x58   : > { %919 = dma.done.wait (%p1342_p11), %s171_s6, 256  }
  0x59   : > { %921 = vsyncadd (%p1342_p11), %s171_s6, 4294967040  ;;  %v1135_v0 = vld [vmem:[%s174_s3] sm:$0xff]  ;;  %v1137_v1 = vld [vmem:[%s174_s3 + $0x8] sm:$0xff]  ;;  %v952_v13 = vmov -1.0   ;;  %s194_s17 = scalar_lea.vmem [#allocation7], %s654_s5  ;;  %s664_s21 = sshll.u32 %s940_s12, 8 }
  0x5a   : > { %v454_v2 = vld [vmem:[#allocation2 + $0x8] sm:$0xff]  ;;  %v200_v3 = vand.u32 1, %v1137_v1  ;;  %v206_v4 = vshrl.u32 %v1137_v1, 1  ;;  %v199_v5 = vand.u32 1, %v1135_v0  ;;  %v205_v6 = vshrl.u32 %v1135_v0, 1  ;;  %s549_s19 = sshll.u32 %s194_s17, 4  ;;  %s1273_s7 = scalar_lea.hbm %s1324_s2, %s664_s21  ;;  %s1275_s19 = int_to_ptr.vmem [resolvable:$true] %s549_s19 }
  0x5b   : > { %519 = vmatprep.mubr.f32.mxu0 %v454_v2  ;;  %v214_v7 = vshrl.u32 %v1137_v1, 2  ;;  %v222_v8 = vshrl.u32 %v1137_v1, 3  ;;  %v213_v9 = vshrl.u32 %v1135_v0, 2  ;;  %v221_v10 = vshrl.u32 %v1135_v0, 3  ;;  %s533_s12 = scalar_lea.sflag [#allocation4], %s1125_s18  ;;  %s862_s8 = scalar_lea.vmem %s1275_s19, 256 }
  0x5c   : > { %vm202_vm0 = vcmp.ne.s32.totalorder %v200_v3, 0  ;;  %v208_v11 = vand.u32 1, %v206_v4  ;;  %vm201_vm1 = vcmp.ne.s32.totalorder %v199_v5, 0  ;;  %v207_v12 = vand.u32 1, %v205_v6  ;;  %p863_p4 = scmp.ne.s32.totalorder %s1275_s19, %s862_s8  ;;  %s954_s15 = smov [#allocation7]  }
  0x5d   : > { %v204_v14 = vsel %vm202_vm0, 1.0, %v952_v13  ;;  %v203_v15 = vsel %vm201_vm1, 1.0, %v952_v13  ;;  %v216_v16 = vand.u32 1, %v214_v7  ;;  %v224_v17 = vand.u32 1, %v222_v8  ;;  %s866_s16 = sshll.u32 %s954_s15, 4  ;;  %s867_s16 = int_to_ptr.vmem [resolvable:$false] %s866_s16 }
  0x5e   : > { %vm210_vm2 = vcmp.ne.s32.totalorder %v208_v11, 0  ;;  %vm209_vm3 = vcmp.ne.s32.totalorder %v207_v12, 0  ;;  %v215_v18 = vand.u32 1, %v213_v9  ;;  %v223_v19 = vand.u32 1, %v221_v10  ;;  %p864_p6 = pnand %p863_p4, %p1071_p13  ;;  %s868_s23 = scalar_lea.vmem %s867_s16, 512 }
  0x5f   : > { %v212_v20 = vsel %vm210_vm2, 1.0, %v952_v13  ;;  %v211_v21 = vsel %vm209_vm3, 1.0, %v952_v13  ;;  %vm218_vm4 = vcmp.ne.s32.totalorder %v216_v16, 0  ;;  %vm226_vm5 = vcmp.ne.s32.totalorder %v224_v17, 0  ;;  %p869_p9 = scmp.lt.s32.totalorder %s1275_s19, %s867_s16  ;;  %p870_p12 = scmp.lt.s32.totalorder %s868_s23, %s862_s8 }
  0x60   : > { %v665_v22 = vpack.c.bf16 %v212_v20, %v204_v14  ;;  %v667_v23 = vpack.c.bf16 %v211_v21, %v203_v15  ;;  %v220_v24 = vsel %vm218_vm4, 1.0, %v952_v13  ;;  %v228_v25 = vsel %vm226_vm5, 1.0, %v952_v13  ;;  %p865_p8 = pneg %p864_p6 }
  0x61   : > { %v669_v26 = vpack.c.bf16 %v228_v25, %v220_v24  ;;  %vm217_vm6 = vcmp.ne.s32.totalorder %v215_v18, 0  ;;  %vm225_vm7 = vcmp.ne.s32.totalorder %v223_v19, 0  ;;  %v230_v27 = vshrl.u32 %v1137_v1, 4  ;;  %p871_p0 = por %p870_p12, %p869_p9 }
  0x62   : > { %666 = vmatprep.subr.bf16.mxu0 %v665_v22  ;;  %v219_v28 = vsel %vm217_vm6, 1.0, %v952_v13  ;;  %v227_v29 = vsel %vm225_vm7, 1.0, %v952_v13  ;;  %v238_v30 = vshrl.u32 %v1137_v1, 5  ;;  %v229_v31 = vshrl.u32 %v1135_v0, 4 }
  0x63   : > { %668 = vmatpush1.bf16.msra.mxu0 %v667_v23  ;;  %v671_v32 = vpack.c.bf16 %v227_v29, %v219_v28  ;;  %v232_v33 = vand.u32 1, %v230_v27  ;;  %v237_v34 = vshrl.u32 %v1135_v0, 5  ;;  %v246_v35 = vshrl.u32 %v1137_v1, 6  ;;  %p872_p5 = pnand %p871_p0, %p865_p8 }
  0x64   : > { %670 = vmatprep.subr.bf16.mxu0 %v669_v26  ;;  %v240_v36 = vand.u32 1, %v238_v30  ;;  %v231_v37 = vand.u32 1, %v229_v31  ;;  %v254_v38 = vshrl.u32 %v1137_v1, 7  ;;  %v245_v39 = vshrl.u32 %v1135_v0, 6 }
  0x65   : > { %vm234_vm8 = vcmp.ne.s32.totalorder %v232_v33, 0  ;;  %v239_v40 = vand.u32 1, %v237_v34  ;;  %v248_v41 = vand.u32 1, %v246_v35  ;;  %v253_v42 = vshrl.u32 %v1135_v0, 7 }
  0x66   : > { %v236_v43 = vsel %vm234_vm8, 1.0, %v952_v13  ;;  %vm242_vm9 = vcmp.ne.s32.totalorder %v240_v36, 0  ;;  %vm233_vm10 = vcmp.ne.s32.totalorder %v231_v37, 0  ;;  %v256_v44 = vand.u32 1, %v254_v38 }
  0x67   : > { %672 = vmatpush1.bf16.msra.mxu0 %v671_v32  ;;  %v244_v45 = vsel %vm242_vm9, 1.0, %v952_v13  ;;  %v235_v46 = vsel %vm233_vm10, 1.0, %v952_v13  ;;  %vm241_vm11 = vcmp.ne.s32.totalorder %v239_v40, 0  ;;  %vm250_vm12 = vcmp.ne.s32.totalorder %v248_v41, 0 }
  0x68   : > { %v673_v47 = vpack.c.bf16 %v244_v45, %v236_v43  ;;  %v243_v48 = vsel %vm241_vm11, 1.0, %v952_v13  ;;  %v252_v49 = vsel %vm250_vm12, 1.0, %v952_v13  ;;  %vm258_vm13 = vcmp.ne.s32.totalorder %v256_v44, 0 }
  0x69   : > { %v675_v50 = vpack.c.bf16 %v243_v48, %v235_v46  ;;  %v260_v51 = vsel %vm258_vm13, 1.0, %v952_v13  ;;  %v247_v52 = vand.u32 1, %v245_v39  ;;  %v255_v53 = vand.u32 1, %v253_v42 }
  0x6a   : > { %674 = vmatprep.subr.bf16.mxu0 %v673_v47  ;;  %v677_v54 = vpack.c.bf16 %v260_v51, %v252_v49  ;;  %v262_v55 = vshrl.u32 %v1137_v1, 8  ;;  %v270_v56 = vshrl.u32 %v1137_v1, 9  ;;  %v261_v57 = vshrl.u32 %v1135_v0, 8 }
  0x6b   : > { %676 = vmatpush1.bf16.msra.mxu0 %v675_v50  ;;  %vm249_vm14 = vcmp.ne.s32.totalorder %v247_v52, 0  ;;  %vm257_vm15 = vcmp.ne.s32.totalorder %v255_v53, 0  ;;  %v269_v58 = vshrl.u32 %v1135_v0, 9  ;;  %v278_v59 = vshrl.u32 %v1137_v1, 10 }
  0x6c   : > { %678 = vmatprep.subr.bf16.mxu0 %v677_v54  ;;  %v251_v60 = vsel %vm249_vm14, 1.0, %v952_v13  ;;  %v259_v61 = vsel %vm257_vm15, 1.0, %v952_v13  ;;  %v264_v62 = vand.u32 1, %v262_v55  ;;  %v272_v63 = vand.u32 1, %v270_v56 }
  0x6d   : > { %v679_v2 = vpack.c.bf16 %v259_v61, %v251_v60  ;;  %v263_v3 = vand.u32 1, %v261_v57  ;;  %v271_v4 = vand.u32 1, %v269_v58  ;;  %v280_v5 = vand.u32 1, %v278_v59 }
  0x6e   : > { %vm266_vm0 = vcmp.ne.s32.totalorder %v264_v62, 0  ;;  %vm274_vm1 = vcmp.ne.s32.totalorder %v272_v63, 0  ;;  %v286_v6 = vshrl.u32 %v1137_v1, 11  ;;  %v277_v7 = vshrl.u32 %v1135_v0, 10 }
  0x6f   : > { %680 = vmatpush1.bf16.msra.mxu0 %v679_v2  ;;  %v268_v8 = vsel %vm266_vm0, 1.0, %v952_v13  ;;  %v276_v9 = vsel %vm274_vm1, 1.0, %v952_v13  ;;  %vm265_vm2 = vcmp.ne.s32.totalorder %v263_v3, 0  ;;  %vm273_vm3 = vcmp.ne.s32.totalorder %v271_v4, 0 }
  0x70   : > { %v681_v10 = vpack.c.bf16 %v276_v9, %v268_v8  ;;  %v267_v11 = vsel %vm265_vm2, 1.0, %v952_v13  ;;  %v275_v12 = vsel %vm273_vm3, 1.0, %v952_v13  ;;  %vm282_vm4 = vcmp.ne.s32.totalorder %v280_v5, 0 }
  0x71   : > { %v683_v14 = vpack.c.bf16 %v275_v12, %v267_v11  ;;  %v284_v15 = vsel %vm282_vm4, 1.0, %v952_v13  ;;  %v288_v16 = vand.u32 1, %v286_v6  ;;  %v279_v17 = vand.u32 1, %v277_v7 }
  0x72   : > { %682 = vmatprep.subr.bf16.mxu0 %v681_v10  ;;  %v285_v18 = vshrl.u32 %v1135_v0, 11  ;;  %v294_v19 = vshrl.u32 %v1137_v1, 12  ;;  %v302_v20 = vshrl.u32 %v1137_v1, 13  ;;  %v293_v21 = vshrl.u32 %v1135_v0, 12 }
  0x73   : > { %684 = vmatpush1.bf16.msra.mxu0 %v683_v14  ;;  %vm290_vm5 = vcmp.ne.s32.totalorder %v288_v16, 0  ;;  %vm281_vm6 = vcmp.ne.s32.totalorder %v279_v17, 0  ;;  %v301_v22 = vshrl.u32 %v1135_v0, 13  ;;  %v310_v23 = vshrl.u32 %v1137_v1, 14 }
  0x74   : > { %v292_v24 = vsel %vm290_vm5, 1.0, %v952_v13  ;;  %v283_v25 = vsel %vm281_vm6, 1.0, %v952_v13  ;;  %v287_v26 = vand.u32 1, %v285_v18  ;;  %v296_v27 = vand.u32 1, %v294_v19 }
  0x75   : > { %v685_v28 = vpack.c.bf16 %v292_v24, %v284_v15  ;;  %v304_v29 = vand.u32 1, %v302_v20  ;;  %v295_v30 = vand.u32 1, %v293_v21  ;;  %v303_v31 = vand.u32 1, %v301_v22 }
  0x76   : > { %vm289_vm7 = vcmp.ne.s32.totalorder %v287_v26, 0  ;;  %vm298_vm8 = vcmp.ne.s32.totalorder %v296_v27, 0  ;;  %v312_v32 = vand.u32 1, %v310_v23  ;;  %v318_v33 = vshrl.u32 %v1137_v1, 15 }
  0x77   : > { %686 = vmatprep.subr.bf16.mxu0 %v685_v28  ;;  %v291_v34 = vsel %vm289_vm7, 1.0, %v952_v13  ;;  %v300_v35 = vsel %vm298_vm8, 1.0, %v952_v13  ;;  %vm306_vm9 = vcmp.ne.s32.totalorder %v304_v29, 0  ;;  %vm297_vm10 = vcmp.ne.s32.totalorder %v295_v30, 0 }
  0x78   : > { %v687_v36 = vpack.c.bf16 %v291_v34, %v283_v25  ;;  %v308_v37 = vsel %vm306_vm9, 1.0, %v952_v13  ;;  %v299_v38 = vsel %vm297_vm10, 1.0, %v952_v13  ;;  %vm305_vm11 = vcmp.ne.s32.totalorder %v303_v31, 0 }
  0x79   : > { %v689_v39 = vpack.c.bf16 %v308_v37, %v300_v35  ;;  %v307_v40 = vsel %vm305_vm11, 1.0, %v952_v13  ;;  %vm314_vm12 = vcmp.ne.s32.totalorder %v312_v32, 0  ;;  %v320_v41 = vand.u32 1, %v318_v33 }
  0x7a   : > { %688 = vmatpush1.bf16.msra.mxu0 %v687_v36  ;;  %v691_v42 = vpack.c.bf16 %v307_v40, %v299_v38  ;;  %v316_v43 = vsel %vm314_vm12, 1.0, %v952_v13  ;;  %v309_v44 = vshrl.u32 %v1135_v0, 14  ;;  %v317_v45 = vshrl.u32 %v1135_v0, 15 }
  0x7b   : > { %690 = vmatprep.subr.bf16.mxu0 %v689_v39  ;;  %vm322_vm13 = vcmp.ne.s32.totalorder %v320_v41, 0  ;;  %v326_v46 = vshrl.u32 %v1137_v1, 16  ;;  %v334_v47 = vshrl.u32 %v1137_v1, 17  ;;  %v325_v48 = vshrl.u32 %v1135_v0, 16 }
  0x7c   : > { %v324_v49 = vsel %vm322_vm13, 1.0, %v952_v13  ;;  %v311_v50 = vand.u32 1, %v309_v44  ;;  %v319_v51 = vand.u32 1, %v317_v45  ;;  %v333_v52 = vshrl.u32 %v1135_v0, 17 }
  0x7d   : > { %v693_v53 = vpack.c.bf16 %v324_v49, %v316_v43  ;;  %v328_v54 = vand.u32 1, %v326_v46  ;;  %v336_v55 = vand.u32 1, %v334_v47  ;;  %v327_v56 = vand.u32 1, %v325_v48 }
  0x7e   : > { %692 = vmatpush1.bf16.msra.mxu0 %v691_v42  ;;  %vm313_vm14 = vcmp.ne.s32.totalorder %v311_v50, 0  ;;  %vm321_vm15 = vcmp.ne.s32.totalorder %v319_v51, 0  ;;  %v335_v57 = vand.u32 1, %v333_v52  ;;  %v342_v58 = vshrl.u32 %v1137_v1, 18 }
  0x7f   : > { %694 = vmatprep.subr.bf16.mxu0 %v693_v53  ;;  %v315_v59 = vsel %vm313_vm14, 1.0, %v952_v13  ;;  %v323_v60 = vsel %vm321_vm15, 1.0, %v952_v13  ;;  %vm330_vm0 = vcmp.ne.s32.totalorder %v328_v54, 0  ;;  %vm338_vm1 = vcmp.ne.s32.totalorder %v336_v55, 0 }
  0x80   : > { %v695_v61 = vpack.c.bf16 %v323_v60, %v315_v59  ;;  %v332_v62 = vsel %vm330_vm0, 1.0, %v952_v13  ;;  %v340_v63 = vsel %vm338_vm1, 1.0, %v952_v13  ;;  %vm329_vm2 = vcmp.ne.s32.totalorder %v327_v56, 0 }
  0x81   : > { %v697_v2 = vpack.c.bf16 %v340_v63, %v332_v62  ;;  %v331_v3 = vsel %vm329_vm2, 1.0, %v952_v13  ;;  %vm337_vm3 = vcmp.ne.s32.totalorder %v335_v57, 0  ;;  %v344_v4 = vand.u32 1, %v342_v58 }
  0x82   : > { %696 = vmatpush1.bf16.msra.mxu0 %v695_v61  ;;  %v339_v5 = vsel %vm337_vm3, 1.0, %v952_v13  ;;  %v350_v6 = vshrl.u32 %v1137_v1, 19  ;;  %v341_v7 = vshrl.u32 %v1135_v0, 18  ;;  %v349_v8 = vshrl.u32 %v1135_v0, 19 }
  0x83   : > { %698 = vmatprep.subr.bf16.mxu0 %v697_v2  ;;  %v699_v9 = vpack.c.bf16 %v339_v5, %v331_v3  ;;  %vm346_vm4 = vcmp.ne.s32.totalorder %v344_v4, 0  ;;  %v358_v10 = vshrl.u32 %v1137_v1, 20  ;;  %v366_v11 = vshrl.u32 %v1137_v1, 21 }
  0x84   : > { %v348_v12 = vsel %vm346_vm4, 1.0, %v952_v13  ;;  %v352_v14 = vand.u32 1, %v350_v6  ;;  %v343_v15 = vand.u32 1, %v341_v7  ;;  %v351_v16 = vand.u32 1, %v349_v8 }
  0x85   : > { %v360_v17 = vand.u32 1, %v358_v10  ;;  %v368_v18 = vand.u32 1, %v366_v11  ;;  %v357_v19 = vshrl.u32 %v1135_v0, 20  ;;  %v365_v20 = vshrl.u32 %v1135_v0, 21 }
  0x86   : > { %700 = vmatpush1.bf16.msra.mxu0 %v699_v9  ;;  %vm354_vm5 = vcmp.ne.s32.totalorder %v352_v14, 0  ;;  %vm345_vm6 = vcmp.ne.s32.totalorder %v343_v15, 0  ;;  %vm353_vm7 = vcmp.ne.s32.totalorder %v351_v16, 0  ;;  %v374_v21 = vshrl.u32 %v1137_v1, 22 }
  0x87   : > { %v356_v22 = vsel %vm354_vm5, 1.0, %v952_v13  ;;  %v347_v23 = vsel %vm345_vm6, 1.0, %v952_v13  ;;  %v355_v24 = vsel %vm353_vm7, 1.0, %v952_v13  ;;  %vm362_vm8 = vcmp.ne.s32.totalorder %v360_v17, 0 }
  0x88   : > { %v701_v25 = vpack.c.bf16 %v356_v22, %v348_v12  ;;  %v703_v26 = vpack.c.bf16 %v355_v24, %v347_v23  ;;  %v364_v27 = vsel %vm362_vm8, 1.0, %v952_v13  ;;  %vm370_vm9 = vcmp.ne.s32.totalorder %v368_v18, 0 }
  0x89   : > { %v372_v28 = vsel %vm370_vm9, 1.0, %v952_v13  ;;  %v359_v29 = vand.u32 1, %v357_v19  ;;  %v367_v30 = vand.u32 1, %v365_v20  ;;  %v376_v31 = vand.u32 1, %v374_v21 }
  0x8a   : > { %702 = vmatprep.subr.bf16.mxu0 %v701_v25  ;;  %v705_v32 = vpack.c.bf16 %v372_v28, %v364_v27  ;;  %v382_v33 = vshrl.u32 %v1137_v1, 23  ;;  %v373_v34 = vshrl.u32 %v1135_v0, 22  ;;  %v381_v35 = vshrl.u32 %v1135_v0, 23 }
  0x8b   : > { %704 = vmatpush1.bf16.msra.mxu0 %v703_v26  ;;  %vm361_vm10 = vcmp.ne.s32.totalorder %v359_v29, 0  ;;  %vm369_vm11 = vcmp.ne.s32.totalorder %v367_v30, 0  ;;  %vm378_vm12 = vcmp.ne.s32.totalorder %v376_v31, 0  ;;  %v390_v36 = vshrl.u32 %v1137_v1, 24 }
  0x8c   : > { %706 = vmatprep.subr.bf16.mxu0 %v705_v32  ;;  %v363_v37 = vsel %vm361_vm10, 1.0, %v952_v13  ;;  %v371_v38 = vsel %vm369_vm11, 1.0, %v952_v13  ;;  %v380_v39 = vsel %vm378_vm12, 1.0, %v952_v13  ;;  %v384_v40 = vand.u32 1, %v382_v33 }
  0x8d   : > { %v707_v41 = vpack.c.bf16 %v371_v38, %v363_v37  ;;  %v375_v42 = vand.u32 1, %v373_v34  ;;  %v383_v43 = vand.u32 1, %v381_v35  ;;  %v392_v44 = vand.u32 1, %v390_v36 }
  0x8e   : > { %vm386_vm13 = vcmp.ne.s32.totalorder %v384_v40, 0  ;;  %v398_v45 = vshrl.u32 %v1137_v1, 25  ;;  %v389_v46 = vshrl.u32 %v1135_v0, 24  ;;  %v397_v47 = vshrl.u32 %v1135_v0, 25 }
  0x8f   : > { %708 = vmatpush1.bf16.msra.mxu0 %v707_v41  ;;  %v388_v48 = vsel %vm386_vm13, 1.0, %v952_v13  ;;  %vm377_vm14 = vcmp.ne.s32.totalorder %v375_v42, 0  ;;  %vm385_vm15 = vcmp.ne.s32.totalorder %v383_v43, 0  ;;  %vm394_vm0 = vcmp.ne.s32.totalorder %v392_v44, 0 }
  0x90   : > { %v709_v49 = vpack.c.bf16 %v388_v48, %v380_v39  ;;  %v379_v50 = vsel %vm377_vm14, 1.0, %v952_v13  ;;  %v387_v51 = vsel %vm385_vm15, 1.0, %v952_v13  ;;  %v396_v52 = vsel %vm394_vm0, 1.0, %v952_v13  ;;  %v453_v39 = vld [vmem:[#allocation2] sm:$0xff] }
  0x91   : > { %v711_v53 = vpack.c.bf16 %v387_v51, %v379_v50  ;;  %v400_v54 = vand.u32 1, %v398_v45  ;;  %v391_v55 = vand.u32 1, %v389_v46  ;;  %v399_v56 = vand.u32 1, %v397_v47 }
  0x92   : > { %710 = vmatprep.subr.bf16.mxu0 %v709_v49  ;;  %v406_v57 = vshrl.u32 %v1137_v1, 26  ;;  %v414_v58 = vshrl.u32 %v1137_v1, 27  ;;  %v405_v59 = vshrl.u32 %v1135_v0, 26  ;;  %v413_v60 = vshrl.u32 %v1135_v0, 27 }
  0x93   : > { %712 = vmatpush1.bf16.msra.mxu0 %v711_v53  ;;  %vm402_vm1 = vcmp.ne.s32.totalorder %v400_v54, 0  ;;  %vm393_vm2 = vcmp.ne.s32.totalorder %v391_v55, 0  ;;  %vm401_vm3 = vcmp.ne.s32.totalorder %v399_v56, 0  ;;  %v422_v61 = vshrl.u32 %v1137_v1, 28 }
  0x94   : > { %v404_v62 = vsel %vm402_vm1, 1.0, %v952_v13  ;;  %v395_v63 = vsel %vm393_vm2, 1.0, %v952_v13  ;;  %v403_v2 = vsel %vm401_vm3, 1.0, %v952_v13  ;;  %v408_v3 = vand.u32 1, %v406_v57 }
  0x95   : > { %v713_v4 = vpack.c.bf16 %v404_v62, %v396_v52  ;;  %v715_v5 = vpack.c.bf16 %v403_v2, %v395_v63  ;;  %v416_v6 = vand.u32 1, %v414_v58  ;;  %v407_v7 = vand.u32 1, %v405_v59 }
  0x96   : > { %vm410_vm4 = vcmp.ne.s32.totalorder %v408_v3, 0  ;;  %v415_v8 = vand.u32 1, %v413_v60  ;;  %v424_v9 = vand.u32 1, %v422_v61  ;;  %v430_v10 = vshrl.u32 %v1137_v1, 29 }
  0x97   : > { %714 = vmatprep.subr.bf16.mxu0 %v713_v4  ;;  %v412_v11 = vsel %vm410_vm4, 1.0, %v952_v13  ;;  %vm418_vm5 = vcmp.ne.s32.totalorder %v416_v6, 0  ;;  %vm409_vm6 = vcmp.ne.s32.totalorder %v407_v7, 0  ;;  %v421_v12 = vshrl.u32 %v1135_v0, 28 }
  0x98   : > { %716 = vmatpush1.bf16.msra.mxu0 %v715_v5  ;;  %v420_v14 = vsel %vm418_vm5, 1.0, %v952_v13  ;;  %v411_v15 = vsel %vm409_vm6, 1.0, %v952_v13  ;;  %vm417_vm7 = vcmp.ne.s32.totalorder %v415_v8, 0  ;;  %vm426_vm8 = vcmp.ne.s32.totalorder %v424_v9, 0 }
  0x99   : > { %v717_v16 = vpack.c.bf16 %v420_v14, %v412_v11  ;;  %v419_v17 = vsel %vm417_vm7, 1.0, %v952_v13  ;;  %v428_v18 = vsel %vm426_vm8, 1.0, %v952_v13  ;;  %v432_v19 = vand.u32 1, %v430_v10 }
  0x9a   : > { %v719_v20 = vpack.c.bf16 %v419_v17, %v411_v15  ;;  %v423_v21 = vand.u32 1, %v421_v12  ;;  %v429_v22 = vshrl.u32 %v1135_v0, 29  ;;  %v438_v23 = vshrl.u32 %v1137_v1, 30 }
  0x9b   : > { %718 = vmatprep.subr.bf16.mxu0 %v717_v16  ;;  %vm434_vm9 = vcmp.ne.s32.totalorder %v432_v19, 0  ;;  %v657_v24 = vshrl.u32 %v1137_v1, 31  ;;  %v437_v25 = vshrl.u32 %v1135_v0, 30  ;;  %v656_v26 = vshrl.u32 %v1135_v0, 31 }
  0x9c   : > { %720 = vmatpush1.bf16.msra.mxu0 %v719_v20  ;;  %v436_v27 = vsel %vm434_vm9, 1.0, %v952_v13  ;;  %vm425_vm10 = vcmp.ne.s32.totalorder %v423_v21, 0  ;;  %v431_v28 = vand.u32 1, %v429_v22  ;;  %v440_v29 = vand.u32 1, %v438_v23 }
  0x9d   : > { %v721_v30 = vpack.c.bf16 %v436_v27, %v428_v18  ;;  %v427_v31 = vsel %vm425_vm10, 1.0, %v952_v13  ;;  %vm450_vm11 = vcmp.ne.s32.totalorder %v657_v24, 0  ;;  %v439_v32 = vand.u32 1, %v437_v25 }
  0x9e   : > { %vm433_vm12 = vcmp.ne.s32.totalorder %v431_v28, 0  ;;  %vm442_vm13 = vcmp.ne.s32.totalorder %v440_v29, 0  ;;  %v452_v33 = vsel %vm450_vm11, 1.0, %v952_v13  ;;  %vm449_vm14 = vcmp.ne.s32.totalorder %v656_v26, 0 }
  0x9f   : > { %722 = vmatprep.subr.bf16.mxu0 %v721_v30  ;;  %v435_v0 = vsel %vm433_vm12, 1.0, %v952_v13  ;;  %v444_v1 = vsel %vm442_vm13, 1.0, %v952_v13  ;;  %vm441_vm15 = vcmp.ne.s32.totalorder %v439_v32, 0  ;;  %v451_v34 = vsel %vm449_vm14, 1.0, %v952_v13 }
  0xa0   : > { %v723_v35 = vpack.c.bf16 %v435_v0, %v427_v31  ;;  %v725_v36 = vpack.c.bf16 %v452_v33, %v444_v1  ;;  %v443_v37 = vsel %vm441_vm15, 1.0, %v952_v13  ;;  %v953_v42 = vmov 4294967295  }
  0xa1   : > { %v727_v38 = vpack.c.bf16 %v451_v34, %v443_v37 }
  0xa2   : > { %724 = vmatpush1.bf16.msra.mxu0 %v723_v35 }
  0xa3   : > { %726 = vmatprep.subr.bf16.mxu0 %v725_v36 }
  0xa6   : > { %728 = vmatpush1.bf16.msra.mxu0 %v727_v38 }
  0xa9   : > { %520 = vmatmul.mubr.f32.vlgmr.msra.gmra.mrb[0].mxu0 %v453_v39 }
 0x17c   : > { %v521_v40 = vpop.f32.mrb[0].mxu0 }
 0x17d   : > { %vm526_vm0 = vcmp.gt.f32.partialorder %v521_v40, 0.0  ;;  %v523_v41 = vpop.f32.mrb[1].mxu0 }
 0x17e   : > { %v528_v43 = vsel %vm526_vm0, 1, %v953_v42  ;;  %vm527_vm1 = vcmp.gt.f32.partialorder %v523_v41, 0.0 }
 0x17f   : > { %530 = vst [vmem:[%s194_s17] sm:$0xff] %v528_v43  ;;  %v529_v13 = vsel %vm527_vm1, 1, %v953_v42 }
 0x180   : > { %531 = vst [vmem:[%s194_s17 + $0x8] sm:$0xff] %v529_v13 }
 0x181   : > { %875 = shalt.err (!%p872_p5)
}
 0x182   : > { %s876_s24 = scalar_lea.hbm %s1273_s7, 256  ;;  %s880_s30 = scalar_lea.hbm %s1324_s2, 512 }
 0x183   : > { %p877_p10 = scmp.ne.s32.totalorder %s1273_s7, %s876_s24  ;;  %p881_p7 = scmp.lt.u32.totalorder %s1273_s7, %s1324_s2 }
 0x184   : > { %p882_p3 = scmp.lt.u32.totalorder %s880_s30, %s876_s24  ;;  %p884_p4 = scmp.lt.u32.totalorder %s876_s24, %s1273_s7 }
 0x185   : > { %p878_p1 = pnand %p877_p10, %p1071_p13 }
 0x186   : > { %p883_p11 = por %p882_p3, %p881_p7 }
 0x187   : > { %p879_p2 = pneg %p878_p1 }
 0x188   : > { %p885_p6 = por %p884_p4, %p883_p11 }
 0x18a   : > { %p886_p8 = pnand %p885_p6, %p879_p2 }
 0x18c   : > { %889 = shalt.err (!%p886_p8)
}
 0x18d   : > { %735 = dma.vmem_to_hbm [thread:$0]  (%p1071_p13), %s1275_s19, 256, %s1273_s7, %s533_s12  }
 0x18e PF: > { %s561_s6 = sand.u32 1, %s928_s9   ;;  %p1343_p9 = scmp.ne.s32.totalorder %s1332_s20, 0 }
 0x18f   : > { %p1344_p12 = scmp.ge.s32.totalorder %s948_s14, 2  ;;  %s562_s3 = scalar_lea.sflag [#allocation4], %s561_s6 }
 0x191   : > { %p746_p0 = pnand %p1344_p12, %p1343_p9 }
 0x193   : > { %923 = dma.done.wait (!%p746_p0), %s562_s3, 256  }
 0x194   : > { %925 = vsyncadd (!%p746_p0), %s562_s3, 4294967040  ;;  %s19_s14 = sadd.s32 1, %s948_s14   ;;  %s1345_s9 = smov %s932_s10 }
 0x195   : > { %p16_p5 = scmp.ge.s32.totalorder %s19_s14, 4   ;;  %s1346_s10 = smov %s936_s11 }
 0x196   : > { %s1347_s11 = smov %s1079_s28  ;;  %s1348_s12 = smov %s944_s13 }
 0x197   : > { %s1349_s13 = smov %s1351_s25  ;;  %18 = sbr.rel (!%p16_p5) target bundleno = 7 (0x7), region = 79 }
 0x19e   :  { %567 = vsyncpa [#allocation3], 1 }
 0x19f   :  { %569 = vsyncpa [#allocation3 + $0x1], 1 }
 0x1a0   :  { %570 = vsyncpa [#allocation6], 1 }
 0x1a1   :  { %572 = vsyncpa [#allocation6 + $0x1], 1 }
 0x1a2   :  { %573 = vsyncpa [#allocation4], 1 }
 0x1a3   :  { %575 = vsyncpa [#allocation4 + $0x1], 1 }

</bundles_post_ra>
